<compile_context>
chip_gen: v6e
topology: v6e:2x2x1
jax: 0.10.0
libtpu: 0.0.40
codegen_flags: <defaults>
</compile_context>

<pallas_src>
import jax
import jax.numpy as jnp
from jax.experimental import pallas as pl
from jax.experimental.pallas import tpu as pltpu

BN_EPS = 1e-5
_VMEM_LIMIT = 32 * 1024 * 1024  # safe on v5e/v6e (128 MiB) and v7x (64 MiB)


def _round_up(n, m):
    return ((n + m - 1) // m) * m


# ---------------------------------------------------------------------------
# Pallas kernel 1: fused cosine-score matmul + row max / argmax.
#   a : (B, t1_pad, C) bf16 (pre-normalized)   b : (B, t2_pad, C) bf16
#   -> node_max (B, 1, t1_pad) f32 , node_idx (B, 1, t1_pad) i32   (lane-dense)
# Grid (B, t1_tiles).  The whole per-batch b block is VMEM-resident (its block
# index is constant across the i axis, so Pallas skips the re-fetch); t2 is
# chunked inside the kernel so temporaries stay <= (t2b, t1b) f32.
# ---------------------------------------------------------------------------
def cosine_max_argmax(a, b):
    B, t1, C = a.shape
    t2 = b.shape[1]

    t1b = min(256, _round_up(t1, 8))
    t1_pad = _round_up(t1, t1b)
    t2b = min(256, _round_up(t2, 8))
    t2_pad = _round_up(t2, t2b)
    n_chunks = t2_pad // t2b

    a_p = a if t1_pad == t1 else jnp.pad(a, ((0, 0), (0, t1_pad - t1), (0, 0)))
    b_p = b if t2_pad == t2 else jnp.pad(b, ((0, 0), (0, t2_pad - t2), (0, 0)))

    def _score_kernel(a_ref, b_ref, max_ref, idx_ref):
        a_tile = a_ref[0]                                         # (t1b, C) bf16

        def body(jj, carry):
            m, idx = carry
            off = pl.multiple_of(jj * t2b, t2b)
            b_chunk = b_ref[0, pl.ds(off, t2b), :]                # (t2b, C) bf16
            # Scores produced transposed: (t2b, t1b); contraction on C (MXU,
            # bf16 operands, f32 accumulation).
            s = jax.lax.dot_general(b_chunk, a_tile, (((1,), (1,)), ((), ())),
                                    preferred_element_type=jnp.float32)
            row = jax.lax.broadcasted_iota(jnp.int32, s.shape, 0) + jj * t2b
            if t2_pad != t2:                                      # mask padded b rows
                s = jnp.where(row < t2, s, -jnp.inf)
            cmax = jnp.max(s, axis=0, keepdims=True)              # (1, t1b)
            cidx = jnp.min(jnp.where(s >= cmax, row, t2_pad),
                           axis=0, keepdims=True)                 # first occurrence
            better = cmax > m
            return jnp.where(better, cmax, m), jnp.where(better, cidx, idx)

        init = (jnp.full((1, t1b), -jnp.inf, jnp.float32),
                jnp.zeros((1, t1b), jnp.int32))
        m, idx = jax.lax.fori_loop(0, n_chunks, body, init,
                                   unroll=(n_chunks <= 8))
        max_ref[0] = m                                            # lane-dense store
        idx_ref[0] = idx

    max_out, idx_out = pl.pallas_call(
        _score_kernel,
        out_shape=(jax.ShapeDtypeStruct((B, 1, t1_pad), jnp.float32),
                   jax.ShapeDtypeStruct((B, 1, t1_pad), jnp.int32)),
        grid=(B, t1_pad // t1b),
        in_specs=[pl.BlockSpec((1, t1b, C), lambda bb, i: (bb, i, 0)),
                  pl.BlockSpec((1, t2_pad, C), lambda bb, i: (bb, 0, 0))],
        out_specs=(pl.BlockSpec((1, 1, t1b), lambda bb, i: (bb, 0, i)),
                   pl.BlockSpec((1, 1, t1b), lambda bb, i: (bb, 0, i))),
        compiler_params=pltpu.CompilerParams(
            dimension_semantics=("parallel", "parallel"),
            vmem_limit_bytes=_VMEM_LIMIT),
    )(a_p, b_p)
    return max_out[:, 0, :t1], idx_out[:, 0, :t1]


# ---------------------------------------------------------------------------
# Pallas kernels 2+3: 1x1 Conv1d (no bias) + BatchNorm1d (batch stats) + ReLU.
#   pass 1: accumulate Gram = X^T X (Cin, Cin) and colsum(X) (1, Cin) only —
#           the x@w matmul is NOT duplicated; BN stats come from these.
#   pass 2: tiled matmul + folded BN affine (scale/shift) + ReLU.
# ---------------------------------------------------------------------------
def _gram_kernel(x_ref, g_ref, s_ref):
    @pl.when(pl.program_id(1) == 0)
    def _():
        g_ref[...] = jnp.zeros_like(g_ref)
        s_ref[...] = jnp.zeros_like(s_ref)
    x = x_ref[...].astype(jnp.float32)                            # (tm, Cin)
    g_ref[0] += jax.lax.dot_general(x, x, (((0,), (0,)), ((), ())),
                                    preferred_element_type=jnp.float32)
    # Small cross-sublane reduce; MXU has plenty of slack in this pass.
    s_ref[0] += jnp.sum(x, axis=0, keepdims=True)


def _matmul_affine_relu_kernel(x_ref, w_ref, scale_ref, shift_ref, o_ref):
    y = jnp.dot(x_ref[...], w_ref[...],
                preferred_element_type=jnp.float32)               # (tm, Cout)
    y = y * scale_ref[...] + shift_ref[...]
    o_ref[...] = jnp.maximum(y, 0.0).astype(o_ref.dtype)


def conv_bn_relu(x, w, gamma, beta):
    """x: (B, L, Cin), w: (Cin, Cout) -> ReLU(BN(x @ w)) as (B, L, Cout)."""
    B, L, Cin = x.shape
    Cout = w.shape[1]
    M = B * L
    x2 = x.reshape(M, Cin).astype(jnp.float32)
    wf = w.astype(jnp.float32)

    tm = min(512, _round_up(M, 8))
    M_pad = _round_up(M, tm)
    x2p = x2 if M_pad == M else jnp.pad(x2, ((0, M_pad - M), (0, 0)))
    grid_m = M_pad // tm

    # ---- pass 1: Gram + column-sum (parallel leading axis for v7x megacore) --
    nc = 2 if (grid_m >= 2 and grid_m % 2 == 0) else 1
    gm = grid_m // nc
    g_parts, s_parts = pl.pallas_call(
        _gram_kernel,
        out_shape=(jax.ShapeDtypeStruct((nc, Cin, Cin), jnp.float32),
                   jax.ShapeDtypeStruct((nc, 1, Cin), jnp.float32)),
        grid=(nc, gm),
        in_specs=[pl.BlockSpec((tm, Cin), lambda c, i: (c * gm + i, 0))],
        out_specs=(pl.BlockSpec((1, Cin, Cin), lambda c, i: (c, 0, 0)),
                   pl.BlockSpec((1, 1, Cin), lambda c, i: (c, 0, 0))),
        compiler_params=pltpu.CompilerParams(
            dimension_semantics=("parallel", "arbitrary"),
            vmem_limit_bytes=_VMEM_LIMIT),
    )(x2p)

    G = jnp.sum(g_parts, axis=0)                                  # (Cin, Cin)
    colsum = jnp.sum(s_parts, axis=0)                             # (1, Cin)
    inv_m = 1.0 / float(M)
    mean_y = (colsum @ wf) * inv_m                                # (1, Cout)
    # TODO(synk): E[y^2]-mean^2 in f32 is cancellation-prone if |mean| >> std;
    # acceptable here, a centered Gram would be the robust alternative.
    ey2 = jnp.sum(wf * (G @ wf), axis=0, keepdims=True) * inv_m   # (1, Cout)
    var = jnp.maximum(ey2 - mean_y * mean_y, 0.0)                 # biased var
    scale = gamma.reshape(1, Cout).astype(jnp.float32) * jax.lax.rsqrt(var + BN_EPS)
    shift = beta.reshape(1, Cout).astype(jnp.float32) - mean_y * scale

    # ---- pass 2: tiled matmul + folded BN affine + ReLU ----------------------
    out = pl.pallas_call(
        _matmul_affine_relu_kernel,
        out_shape=jax.ShapeDtypeStruct((M_pad, Cout), x.dtype),
        grid=(grid_m,),
        in_specs=[pl.BlockSpec((tm, Cin), lambda i: (i, 0)),
                  pl.BlockSpec((Cin, Cout), lambda i: (0, 0)),
                  pl.BlockSpec((1, Cout), lambda i: (0, 0)),
                  pl.BlockSpec((1, Cout), lambda i: (0, 0))],
        out_specs=pl.BlockSpec((tm, Cout), lambda i: (i, 0)),
        compiler_params=pltpu.CompilerParams(
            dimension_semantics=("parallel",),
            vmem_limit_bytes=_VMEM_LIMIT),
    )(x2p, wf, scale, shift)
    return out[:M].reshape(B, L, Cout)


# ---------------------------------------------------------------------------
# ToMe bipartite soft matching.  Score matmul + row max/argmax runs in Pallas;
# the remaining index bookkeeping (argsort / gather / scatter-mean) is
# data-dependent indexing and stays in plain JAX.
# ---------------------------------------------------------------------------
def bipartite_soft_matching(metric, r):
    B, t, _ = metric.shape
    r = min(int(r), t // 2)
    assert r > 0, "r must be positive (npoint must be < N and >= N/2)"

    # Normalize once (XLA, cheap), then bf16 for the MXU-native score matmul.
    # TODO(synk): zero-norm rows produce NaN here like PyTorch's norm-divide,
    # but the in-kernel max ignores NaN scores instead of propagating them.
    norm = jnp.sqrt(jnp.sum(jnp.square(metric.astype(jnp.float32)),
                            axis=-1, keepdims=True))
    metric_n = (metric.astype(jnp.float32) / norm).astype(jnp.bfloat16)

    a = metric_n[:, 0::2, :]
    b = metric_n[:, 1::2, :]
    t2 = b.shape[1]

    node_max, node_idx = cosine_max_argmax(a, b)      # (B, t1) each
    edge_idx = jnp.argsort(-node_max, axis=-1)        # descending by best score
    unm_idx = edge_idx[:, r:]                         # (B, t1 - r) kept src
    src_idx = edge_idx[:, :r]                         # (B, r)      merged src
    dst_idx = jnp.take_along_axis(node_idx, src_idx, axis=-1)     # (B, r)

    def merge(x):                                     # mode="mean", include_self
        src = x[:, 0::2, :]
        dst = x[:, 1::2, :]
        unm = jnp.take_along_axis(src, unm_idx[:, :, None], axis=1)
        src_sel = jnp.take_along_axis(src, src_idx[:, :, None], axis=1)

        # TODO(synk): the scatter-mean below lowers to an XLA scatter; for
        # large r it could be a Pallas gather/accumulate kernel driven by
        # scalar-prefetched dst_idx, or a sort + segment_sum.
        def one(dst_b, idx_b, src_b):
            summed = dst_b.at[idx_b].add(src_b)
            counts = jnp.ones((t2, 1), dst_b.dtype).at[idx_b].add(1.0)
            return summed / counts

        dst_m = jax.vmap(one)(dst, dst_idx, src_sel)
        return jnp.concatenate([unm, dst_m], axis=1)

    return merge


# ---------------------------------------------------------------------------
# TOME forward
# ---------------------------------------------------------------------------
def tome_forward(points, xyz, params, npoint, compress=False, use_xyz=False):
    r = points.shape[1] - npoint
    metric = xyz if use_xyz else points
    merge = bipartite_soft_matching(metric, r)

    merged_pts = merge(points)                        # (B, npoint, Cin)
    merged_xyz = merge(xyz)                           # (B, npoint, 3)
    # TODO(synk): the `compress` (unmerge) branch is intentionally dropped —
    # TOME.forward never consumes compressed_pts/xyz.
    # TODO(synk): BatchNorm running-stat updates (training side effect) are not
    # modeled; they do not affect the returned tensors.
    del compress

    out_pts = conv_bn_relu(merged_pts, params["w"], params["gamma"], params["beta"])
    return out_pts, merged_xyz


if __name__ == "__main__":
    key = jax.random.PRNGKey(0)
    B, N, Cin, Cout = 2, 16, 8, 16
    npoint = 12                                        # r = N - npoint = 4 <= N//2

    k1, k2, k3 = jax.random.split(key, 3)
    points = jax.random.normal(k1, (B, N, Cin), jnp.float32)
    xyz = jax.random.normal(k2, (B, N, 3), jnp.float32)

    # Deterministic parameter init (Conv1d weight (Cout, Cin, 1) -> (Cin, Cout)).
    w = 0.1 * jax.random.normal(k3, (Cin, Cout), jnp.float32)
    gamma = 1.0 + 0.1 * jnp.arange(Cout, dtype=jnp.float32)
    beta = 0.01 * jnp.arange(Cout, dtype=jnp.float32)
    params = {"w": w, "gamma": gamma, "beta": beta}

    out_pts, merged_xyz = tome_forward(points, xyz, params, npoint)
    jax.block_until_ready((out_pts, merged_xyz))

    assert out_pts.shape == (B, npoint, Cout), out_pts.shape
    assert merged_xyz.shape == (B, npoint, 3), merged_xyz.shape
    assert bool(jnp.all(out_pts >= 0.0)) and bool(jnp.isfinite(out_pts).all())
    print("KERNEL_OK")
</pallas_src>

<mosaic_0001>
module attributes {stable_mosaic.version = 11 : i64} {
  func.func @_score_kernel(%arg0: i32, %arg1: i32, %arg2: memref<1x8x8xbf16, #tpu.memory_space<vmem>>, %arg3: memref<1x8x8xbf16, #tpu.memory_space<vmem>>, %arg4: memref<1x1x8xf32, #tpu.memory_space<vmem>>, %arg5: memref<1x1x8xi32, #tpu.memory_space<vmem>>) attributes {dimension_semantics = [#tpu.dimension_semantics<parallel>, #tpu.dimension_semantics<parallel>], iteration_bounds = array<i64: 2, 1>, scalar_prefetch = 0 : i64, scratch_operands = 0 : i64, tpu.core_type = #tpu.core_type<tc>, window_params = [{transform_indices = @transform_0, window_bounds = array<i64: 1, 8, 8>}, {transform_indices = @transform_1, window_bounds = array<i64: 1, 8, 8>}, {transform_indices = @transform_2, window_bounds = array<i64: 1, 1, 8>}, {transform_indices = @transform_3, window_bounds = array<i64: 1, 1, 8>}]} {
    %c0 = arith.constant 0 : index
    %c0_0 = arith.constant 0 : index
    %c0_1 = arith.constant 0 : index
    %0 = vector.load %arg2[%c0, %c0_0, %c0_1] : memref<1x8x8xbf16, #tpu.memory_space<vmem>>, vector<1x8x8xbf16>
    %1 = vector.shape_cast %0 : vector<1x8x8xbf16> to vector<8x8xbf16>
    %cst = arith.constant 0xFF800000 : f32
    %2 = vector.broadcast %cst : f32 to vector<1x8xf32>
    %c0_i32 = arith.constant 0 : i32
    %3 = vector.broadcast %c0_i32 : i32 to vector<1x8xi32>
    %c0_i32_2 = arith.constant 0 : i32
    %c8_i32 = arith.constant 8 : i32
    %4 = arith.muli %c0_i32_2, %c8_i32 : i32
    %5 = tpu.assume_multiple %4, 8 : i32
    %c0_3 = arith.constant 0 : index
    %6 = arith.index_cast %5 : i32 to index
    %c0_4 = arith.constant 0 : index
    %7 = vector.load %arg3[%c0_3, %6, %c0_4] : memref<1x8x8xbf16, #tpu.memory_space<vmem>>, vector<1x8x8xbf16>
    %8 = vector.shape_cast %7 : vector<1x8x8xbf16> to vector<8x8xbf16>
    %cst_5 = arith.constant dense<0.000000e+00> : vector<8x8xf32>
    %9 = tpu.matmul %8, %1, %cst_5 {dimension_numbers = #tpu.dot_dimension_numbers<[1], [1], [0], [0], [0, 0, 1, 0], [], []>} : vector<8x8xbf16>, vector<8x8xbf16>, vector<8x8xf32> -> vector<8x8xf32>
    %10 = tpu.iota {dimensions = array<i32: 0>} : vector<8x8xi32>
    %c8_i32_6 = arith.constant 8 : i32
    %11 = arith.muli %c0_i32_2, %c8_i32_6 : i32
    %12 = vector.broadcast %11 : i32 to vector<8x8xi32>
    %13 = arith.addi %10, %12 : vector<8x8xi32>
    %cst_7 = arith.constant dense<0xFF800000> : vector<8xf32>
    %14 = vector.multi_reduction <maximumf>, %9, %cst_7 [0] : vector<8x8xf32> to vector<8xf32>
    %15 = vector.shape_cast %14 : vector<8xf32> to vector<1x8xf32>
    %16 = vector.broadcast %15 : vector<1x8xf32> to vector<8x8xf32>
    %17 = arith.cmpf oge, %9, %16 : vector<8x8xf32>
    %c8_i32_8 = arith.constant 8 : i32
    %18 = vector.broadcast %c8_i32_8 : i32 to vector<8x8xi32>
    %19 = arith.select %17, %13, %18 : vector<8x8xi1>, vector<8x8xi32>
    %cst_9 = arith.constant dense<2147483647> : vector<8xi32>
    %20 = vector.multi_reduction <minsi>, %19, %cst_9 [0] : vector<8x8xi32> to vector<8xi32>
    %21 = vector.shape_cast %20 : vector<8xi32> to vector<1x8xi32>
    %22 = arith.cmpf ogt, %15, %2 : vector<1x8xf32>
    %23 = arith.select %22, %15, %2 : vector<1x8xi1>, vector<1x8xf32>
    %24 = arith.select %22, %21, %3 : vector<1x8xi1>, vector<1x8xi32>
    %c1_i32 = arith.constant 1 : i32
    %c0_10 = arith.constant 0 : index
    %c0_11 = arith.constant 0 : index
    %c0_12 = arith.constant 0 : index
    %25 = vector.load %arg4[%c0_10, %c0_11, %c0_12] : memref<1x1x8xf32, #tpu.memory_space<vmem>>, vector<1x1x8xf32>
    %26 = vector.shape_cast %25 : vector<1x1x8xf32> to vector<1x8xf32>
    %27 = vector.shape_cast %23 : vector<1x8xf32> to vector<1x1x8xf32>
    tpu.vector_store %arg4[%c0_10, %c0_11, %c0_12], %27 {strides = array<i32>} : memref<1x1x8xf32, #tpu.memory_space<vmem>>, vector<1x1x8xf32>,
    %c0_13 = arith.constant 0 : index
    %c0_14 = arith.constant 0 : index
    %c0_15 = arith.constant 0 : index
    %28 = vector.load %arg5[%c0_13, %c0_14, %c0_15] : memref<1x1x8xi32, #tpu.memory_space<vmem>>, vector<1x1x8xi32>
    %29 = vector.shape_cast %28 : vector<1x1x8xi32> to vector<1x8xi32>
    %30 = vector.shape_cast %24 : vector<1x8xi32> to vector<1x1x8xi32>
    tpu.vector_store %arg5[%c0_13, %c0_14, %c0_15], %30 {strides = array<i32>} : memref<1x1x8xi32, #tpu.memory_space<vmem>>, vector<1x1x8xi32>,
    return
  }
  func.func @transform_0(%arg0: i32, %arg1: i32) -> (i32, i32, i32) {
    %c0_i32 = arith.constant 0 : i32
    %c0_i32_0 = arith.constant 0 : i32
    return %arg0, %arg1, %c0_i32 : i32, i32, i32
  }
  func.func @transform_1(%arg0: i32, %arg1: i32) -> (i32, i32, i32) {
    %c0_i32 = arith.constant 0 : i32
    %c0_i32_0 = arith.constant 0 : i32
    %c0_i32_1 = arith.constant 0 : i32
    return %arg0, %c0_i32, %c0_i32_0 : i32, i32, i32
  }
  func.func @transform_2(%arg0: i32, %arg1: i32) -> (i32, i32, i32) {
    %c0_i32 = arith.constant 0 : i32
    %c0_i32_0 = arith.constant 0 : i32
    return %arg0, %c0_i32, %arg1 : i32, i32, i32
  }
  func.func @transform_3(%arg0: i32, %arg1: i32) -> (i32, i32, i32) {
    %c0_i32 = arith.constant 0 : i32
    %c0_i32_0 = arith.constant 0 : i32
    return %arg0, %c0_i32, %arg1 : i32, i32, i32
  }
}

</mosaic_0001>

<bundles_post_ra>
// kernel: tpu_custom_call.1
= control target key start
LH: loop header
LB: loop body
LE: loop exit
PB: predicated region body
PF: predicated region fallthrough
CT: control target
= control target key end

     0   :  { %9 = vsyncpa [#allocation3], 0  ;;  %s993_s0 = inlined_call_operand.hbm [shape: bf16[2,8,8], index: 0, kind: input, shape index: {}]   ;;  %s994_s1 = inlined_call_operand.hbm [shape: bf16[2,8,8], index: 1, kind: input, shape index: {}]   ;;  %s995_s2 = inlined_call_operand.hbm [shape: f32[2,1,8], index: 2, kind: output, shape index: {0}]   ;;  %s996_s3 = inlined_call_operand.hbm [shape: s32[2,1,8], index: 3, kind: output, shape index: {1}]  }
   0x1   :  { %11 = vsyncpa [#allocation3 + $0x1], 0 }
   0x2   :  { %12 = vsyncpa [#allocation6], 0 }
   0x3   :  { %14 = vsyncpa [#allocation6 + $0x1], 0 }
   0x4   :  { %15 = vsyncpa [#allocation4], 0 }
   0x5   :  { %17 = vsyncpa [#allocation4 + $0x1], 0 }
   0x6   :  { %18 = vsyncpa [#allocation9], 0 }
   0x7   :  { %20 = vsyncpa [#allocation9 + $0x1], 0  ;;  %s784_s12 = smov 0   ;;  %s786_s13 = smov 0  }
   0x8   :  { %s788_s14 = smov 0   ;;  %s790_s15 = smov 0  }
   0x9   :  { %s792_s16 = smov 0   ;;  %s794_s17 = smov 0  }
   0xa LB: > { %s488_s18 = sadd.s32 4294967295, %s756_s17   ;;  %s489_s19 = sadd.s32 4294967294, %s756_s17   ;;  %s756_s17 = sphi %s794_s17, %s26_s17   ;;  %s752_s16 = sphi %s792_s16, %s1008_s16   ;;  %s748_s15 = sphi %s790_s15, %s1007_s15   ;;  %s744_s14 = sphi %s788_s14, %s1006_s14   ;;  %s740_s13 = sphi %s786_s13, %s1005_s13   ;;  %s736_s12 = sphi %s784_s12, %s1004_s12  }
   0xb   : > { %s38_s20 = sadd.s32 1, %s752_s16  ;;  %s47_s21 = sadd.s32 1, %s744_s14 }
   0xc   : > { %p40_p0 = scmp.ge.s32.totalorder %s38_s20, 2  ;;  %p54_p1 = scmp.ne.s32.totalorder %s744_s14, %s740_s13 }
   0xd   : > { %p55_p2 = scmp.eq.s32.totalorder %s756_s17, 0  ;;  %p60_p3 = scmp.ne.s32.totalorder %s740_s13, %s736_s12 }
   0xe   : > { %s1010_s20 = smov (%p40_p0, %s38_s20), 0  ;;  %p61_p5 = scmp.eq.s32.totalorder %s488_s18, 0 }
   0xf   : > { %p825_p4 = por %p55_p2, %p54_p1  ;;  %s42_s23 = ssub.s32 %s752_s16, %s1010_s20 }
  0x10   : > { %p112_p6 = scmp.eq.s32.totalorder %s488_s18, 1  ;;  %p45_p7 = scmp.eq.s32.totalorder %s42_s23, 0 }
  0x11   : > { %p831_p8 = por %p61_p5, %p60_p3  ;;  %p118_p10 = scmp.eq.s32.totalorder %s489_s19, 1 }
  0x12   : > { %p835_p9 = por %p112_p6, %p54_p1  ;;  %p534_p13 = scmp.lt.s32.totalorder %s756_s17, 2 }
  0x13   : > { %s840_s26 = scalar_select %p45_p7, %s744_s14, %s47_s21  }
  0x14   : > { %p842_p11 = por %p118_p10, %p60_p3  ;;  %s849_s28 = sand.u32 1, %s744_s14  }
  0x15   : > { %s492_s29 = sshll.u32 %s849_s28, 2  ;;  %s493_s30 = sshll.u32 %s752_s16, 6 }
  0x16   : > { %s176_s6 = scalar_lea.hbm %s993_s0, %s493_s30  ;;  %s170_s7 = scalar_lea.vmem [#allocation2], %s492_s29 }
  0x17   : > { %s178_s8 = sshll.u32 %s170_s7, 4  ;;  %p858_p0 = pnand %p534_p13, %p825_p4  ;;  %s179_s8 = int_to_ptr.vmem [resolvable:$true] %s178_s8 }
  0x18   : > { %p496_p1 = scmp.ge.s32.totalorder %s756_s17, 1  ;;  %p201_p2 = scmp.lt.s32.totalorder %s756_s17, 3 }
  0x19   : > { %s167_s10 = scalar_lea.sflag [#allocation3], %s849_s28  ;;  %p588_p3 = pneg %p858_p0 }
  0x1a   : > { %s599_s11 = scalar_lea.vmem %s179_s8, 64  ;;  %s758_s18 = smov [#allocation2]  }
  0x1b   : > { %p600_p5 = scmp.ne.s32.totalorder %s179_s8, %s599_s11  ;;  %s604_s19 = sshll.u32 %s758_s18, 4  ;;  %s605_s19 = int_to_ptr.vmem [resolvable:$false] %s604_s19 }
  0x1c   : > { %s606_s21 = scalar_lea.vmem %s605_s19, 128  ;;  %p607_p4 = scmp.lt.s32.totalorder %s179_s8, %s605_s19 }
  0x1d   : > { %p602_p6 = pnand %p600_p5, %p588_p3  ;;  %p608_p10 = scmp.lt.s32.totalorder %s606_s21, %s599_s11 }
  0x1f   : > { %p603_p7 = pneg %p602_p6  ;;  %p609_p13 = por %p608_p10, %p607_p4 }
  0x21   : > { %p610_p12 = pnand %p609_p13, %p603_p7 }
  0x23   : > { %613 = shalt.err (!%p610_p12)
}
  0x24   : > { %523 = dma.hbm_to_vmem [thread:$0]  (!%p858_p0), %s176_s6, 64, %s179_s8, %s167_s10  }
  0x25   : > { %p876_p5 = pnand %p496_p1, %p201_p2  ;;  %s194_s5 = scalar_lea.hbm %s994_s1, %s493_s30 }
  0x26   : > { %s189_s7 = scalar_lea.vmem [#allocation5], %s492_s29  ;;  %s186_s18 = scalar_lea.sflag [#allocation6], %s849_s28 }
  0x27   : > { %s196_s11 = sshll.u32 %s189_s7, 4  ;;  %s759_s6 = smov [#allocation5]   ;;  %s197_s11 = int_to_ptr.vmem [resolvable:$true] %s196_s11 }
  0x28   : > { %s627_s19 = scalar_lea.vmem %s197_s11, 64  ;;  %s632_s8 = sshll.u32 %s759_s6, 4  ;;  %s633_s8 = int_to_ptr.vmem [resolvable:$false] %s632_s8 }
  0x29   : > { %p628_p12 = scmp.ne.s32.totalorder %s197_s11, %s627_s19  ;;  %s634_s10 = scalar_lea.vmem %s633_s8, 128 }
  0x2a   : > { %p635_p1 = scmp.lt.s32.totalorder %s197_s11, %s633_s8  ;;  %p636_p2 = scmp.lt.s32.totalorder %s634_s10, %s627_s19 }
  0x2b   : > { %p630_p6 = pnand %p628_p12, %p588_p3 }
  0x2c   : > { %p637_p4 = por %p636_p2, %p635_p1 }
  0x2d   : > { %p631_p7 = pneg %p630_p6 }
  0x2f   : > { %p638_p10 = pnand %p637_p4, %p631_p7 }
  0x31   : > { %641 = shalt.err (!%p638_p10)
}
  0x32   : > { %526 = dma.hbm_to_vmem [thread:$0]  (!%p858_p0), %s194_s5, 64, %s197_s11, %s186_s18  }
  0x33   : > { %205 = sbr.rel (%p876_p5) target bundleno = 313 (0x139), region = 28  ;;  %s892_s28 = sand.u32 (!%p876_p5), 1, %s740_s13  }
  0x34   : > { %s497_s29 = sshll.u32 (!%p876_p5), %s892_s28, 2  ;;  %s208_s30 = scalar_lea.sflag (!%p876_p5), [#allocation3], %s892_s28 }
  0x35   : > { %s211_s21 = scalar_lea.vmem (!%p876_p5), [#allocation2], %s497_s29 }
  0x38   : > { %719 = dma.done.wait (%p831_p8), %s208_s30, 64  }
  0x39   : > { %721 = vsyncadd (%p831_p8), %s208_s30, 4294967232  ;;  %s217_s9 = scalar_lea.sflag [#allocation6], %s892_s28  ;;  %s220_s23 = scalar_lea.vmem [#allocation5], %s497_s29 }
  0x3a   : > { %723 = dma.done.wait (%p831_p8), %s217_s9, 64  }
  0x3b   : > { %725 = vsyncadd (%p831_p8), %s217_s9, 4294967232  ;;  %v760_v0 = vmov 0.0   ;;  %vm761_vm0 = vmmov 0   ;;  %vm254_vm1 = vcmask 64512   ;;  %v252_v1 = vld [vmem:[%s211_s21] sm:$0xf]  ;;  %v301_v12 = vlaneseq }
  0x3c   : > { %506 = vmatprep.subr.bf16.mxu0 %v760_v0  ;;  %508 = vmatprep.mubr.msk.bf16.mxu0 %vm761_vm0, %v760_v0  ;;  %v259_v2 = vsel %vm254_vm1, %v252_v1, 0  ;;  %v253_v3 = vld [vmem:[%s220_s23] sm:$0xf]  ;;  %s500_s24 = sshll.u32 %s748_s15, 4  ;;  %s244_s22 = scalar_lea.vmem [#allocation7], %s892_s28  ;;  %vm325_vm2 = vcmask 57344  }
  0x3d   : > { %507 = vmatpush3.bf16.xpose.msra.mxu0 %v259_v2  ;;  %v302_v15 = vshrl.u32 %v301_v12, 7  ;;  %s346_s4 = sshll.u32 %s244_s22, 4  ;;  %s915_s11 = scalar_lea.hbm %s995_s2, %s500_s24  ;;  %s917_s4 = int_to_ptr.vmem [resolvable:$true] %s346_s4 }
  0x3e   : > { %s329_s18 = scalar_lea.sflag [#allocation4], %s892_s28  ;;  %s642_s19 = scalar_lea.vmem %s917_s4, 16 }
  0x3f   : > { %p643_p8 = scmp.ne.s32.totalorder %s917_s4, %s642_s19  ;;  %s762_s6 = smov [#allocation7]  }
  0x40   : > { %s646_s8 = sshll.u32 %s762_s6, 4  ;;  %s647_s8 = int_to_ptr.vmem [resolvable:$false] %s646_s8 }
  0x41   : > { %p644_p0 = pnand %p643_p8, %p835_p9  ;;  %s648_s10 = scalar_lea.vmem %s647_s8, 32 }
  0x42   : > { %p649_p13 = scmp.lt.s32.totalorder %s917_s4, %s647_s8  ;;  %p650_p5 = scmp.lt.s32.totalorder %s648_s10, %s642_s19 }
  0x43   : > { %p645_p3 = pneg %p644_p0 }
  0x44   : > { %509 = vmatmul.mubr.msk.bf16.vlgmr.msra.gmra.mxu0 %vm254_vm1, %v253_v3  ;;  %p651_p12 = por %p650_p5, %p649_p13 }
  0x46   : > { %p652_p6 = pnand %p651_p12, %p645_p3 }
 0x104   : > { %v295_v4 = vpop.f32.mrf.mxu0 }
 0x105   : > { %v303_v5 = vsel %vm254_vm1, %v295_v4, -inf }
 0x106   : > { %v304_v6 = vrot.slane %v303_v5, 4  ;;  %v510_v7 = vpop.f32.mrf.mxu0 }
 0x108   : > { %v305_v8 = vmax.f32 %v303_v5, %v304_v6  ;;  %v298_v9 = vpop.f32.mrf.mxu0 }
 0x10a   : > { %v306_v10 = vrot.slane %v305_v8, 2  ;;  %v511_v11 = vpop.f32.mrf.mxu0 }
 0x10c   : > { %v307_v13 = vmax.f32 %v305_v8, %v306_v10 }
 0x10e   : > { %v308_v14 = vrot.slane %v307_v13, 1 }
 0x110   : > { %v309_v16 = vmax.f32 %v307_v13, %v308_v14 }
 0x112   : > { %vm310_vm3 = vcmp.ge.f32.partialorder %v295_v4, %v309_v16  ;;  %vm322_vm4 = vcmp.gt.f32.partialorder %v309_v16, -inf }
 0x113   : > { %v311_v17 = vsel %vm310_vm3, %v302_v15, 8  ;;  %v323_v18 = vsel %vm322_vm4, %v309_v16, -inf }
 0x114   : > { %v312_v19 = vsel %vm254_vm1, %v311_v17, 2147483647  ;;  %326 = vst.msk [vmem:[%s244_s22] sm:$0x1] %vm325_vm2, %v323_v18 }
 0x115   : > { %v313_v20 = vrot.slane %v312_v19, 4 }
 0x116   : > { %655 = shalt.err (!%p652_p6)
}
 0x117   : > { %s656_s29 = scalar_lea.hbm %s915_s11, 16  ;;  %s660_s9 = scalar_lea.hbm %s995_s2, 32 }
 0x118   : > { %p657_p7 = scmp.ne.s32.totalorder %s915_s11, %s656_s29  ;;  %p661_p4 = scmp.lt.s32.totalorder %s915_s11, %s995_s2 }
 0x119   : > { %p662_p10 = scmp.lt.s32.totalorder %s660_s9, %s656_s29 }
 0x11a   : > { %p658_p1 = pnand %p657_p7, %p835_p9 }
 0x11b   : > { %p663_p8 = por %p662_p10, %p661_p4 }
 0x11c   : > { %p659_p2 = pneg %p658_p1 }
 0x11e   : > { %p664_p0 = pnand %p663_p8, %p659_p2 }
 0x120   : > { %667 = shalt.err (!%p664_p0)
}
 0x121   : > { %516 = dma.vmem_to_hbm [thread:$0]  (%p835_p9), %s917_s4, 16, %s915_s11, %s329_s18   ;;  %vm314_vm5 = vcmp.lt.s32.totalorder %v312_v19, %v313_v20 }
 0x122   : > { %v315_v21 = vsel %vm314_vm5, %v312_v19, %v313_v20  ;;  %s250_s5 = scalar_lea.vmem [#allocation8], %s892_s28  ;;  %s949_s8 = scalar_lea.hbm %s996_s3, %s500_s24 }
 0x123   : > { %v316_v22 = vrot.slane %v315_v21, 2  ;;  %s360_s7 = sshll.u32 %s250_s5, 4  ;;  %s333_s4 = scalar_lea.sflag [#allocation9], %s892_s28  ;;  %s361_s7 = int_to_ptr.vmem [resolvable:$true] %s360_s7 }
 0x124   : > { %s668_s11 = scalar_lea.vmem %s361_s7, 16  ;;  %s763_s18 = smov [#allocation8]  }
 0x125   : > { %vm317_vm6 = vcmp.lt.s32.totalorder %v315_v21, %v316_v22  ;;  %p669_p3 = scmp.ne.s32.totalorder %s361_s7, %s668_s11  ;;  %s672_s10 = sshll.u32 %s763_s18, 4  ;;  %s673_s10 = int_to_ptr.vmem [resolvable:$false] %s672_s10 }
 0x126   : > { %v318_v23 = vsel %vm317_vm6, %v315_v21, %v316_v22  ;;  %s674_s15 = scalar_lea.vmem %s673_s10, 32  ;;  %p675_p12 = scmp.lt.s32.totalorder %s361_s7, %s673_s10 }
 0x127   : > { %v319_v24 = vrot.slane %v318_v23, 1  ;;  %p670_p13 = pnand %p669_p3, %p835_p9  ;;  %p676_p6 = scmp.lt.s32.totalorder %s674_s15, %s668_s11 }
 0x129   : > { %vm320_vm7 = vcmp.lt.s32.totalorder %v318_v23, %v319_v24  ;;  %p671_p5 = pneg %p670_p13  ;;  %p677_p7 = por %p676_p6, %p675_p12 }
 0x12a   : > { %v321_v25 = vsel %vm320_vm7, %v318_v23, %v319_v24 }
 0x12b   : > { %v324_v26 = vsel %vm322_vm4, %v321_v25, 0  ;;  %p678_p1 = pnand %p677_p7, %p671_p5 }
 0x12c   : > { %327 = vst.msk [vmem:[%s250_s5] sm:$0x1] %vm325_vm2, %v324_v26 }
 0x12d   : > { %681 = shalt.err (!%p678_p1)
}
 0x12e   : > { %s682_s24 = scalar_lea.hbm %s949_s8, 16  ;;  %s686_s30 = scalar_lea.hbm %s996_s3, 32 }
 0x12f   : > { %p683_p2 = scmp.ne.s32.totalorder %s949_s8, %s682_s24  ;;  %p687_p8 = scmp.lt.s32.totalorder %s949_s8, %s996_s3 }
 0x130   : > { %p688_p0 = scmp.lt.s32.totalorder %s686_s30, %s682_s24 }
 0x131   : > { %p684_p4 = pnand %p683_p2, %p835_p9 }
 0x132   : > { %p689_p3 = por %p688_p0, %p687_p8 }
 0x133   : > { %p685_p10 = pneg %p684_p4 }
 0x135   : > { %p690_p13 = pnand %p689_p3, %p685_p10 }
 0x137   : > { %693 = shalt.err (!%p690_p13)
}
 0x138   : > { %517 = dma.vmem_to_hbm [thread:$0]  (%p835_p9), %s361_s7, 16, %s949_s8, %s333_s4  }
 0x139 PF: > { %s372_s23 = sand.u32 1, %s736_s12   ;;  %p1003_p5 = scmp.ge.s32.totalorder %s756_s17, 2 }
 0x13a   : > { %s373_s22 = scalar_lea.sflag [#allocation4], %s372_s23 }
 0x13b   : > { %p528_p12 = pnand %p1003_p5, %p842_p11 }
 0x13d   : > { %p529_p6 = pneg %p528_p12 }
 0x13f   : > { %727 = dma.done.wait (%p529_p6), %s373_s22, 16  }
 0x140   : > { %729 = vsyncadd (%p529_p6), %s373_s22, 4294967280  ;;  %s381_s5 = scalar_lea.sflag [#allocation9], %s372_s23 }
 0x141   : > { %731 = dma.done.wait (%p529_p6), %s381_s5, 16  }
 0x142   : > { %733 = vsyncadd (%p529_p6), %s381_s5, 4294967280  ;;  %s26_s17 = sadd.s32 1, %s756_s17   ;;  %s1004_s12 = smov %s740_s13 }
 0x143   : > { %p23_p7 = scmp.ge.s32.totalorder %s26_s17, 4   ;;  %s1005_s13 = smov %s744_s14 }
 0x144   : > { %s1006_s14 = smov %s840_s26  ;;  %s1007_s15 = smov %s752_s16 }
 0x145   : > { %s1008_s16 = smov %s1010_s20  ;;  %25 = sbr.rel (!%p23_p7) target bundleno = 10 (0xa), region = 103 }
 0x14a   :  { %385 = vsyncpa [#allocation3], 1 }
 0x14b   :  { %387 = vsyncpa [#allocation3 + $0x1], 1 }
 0x14c   :  { %388 = vsyncpa [#allocation6], 1 }
 0x14d   :  { %390 = vsyncpa [#allocation6 + $0x1], 1 }
 0x14e   :  { %391 = vsyncpa [#allocation4], 1 }
 0x14f   :  { %393 = vsyncpa [#allocation4 + $0x1], 1 }
 0x150   :  { %394 = vsyncpa [#allocation9], 1 }
 0x151   :  { %396 = vsyncpa [#allocation9 + $0x1], 1 }

</bundles_post_ra>
